<compile_context>
chip_gen: v6e
topology: v6e:2x2x1
jax: 0.10.0
libtpu: 0.0.40
codegen_flags: <defaults>
</compile_context>

<pallas_src>
import math

import jax
import jax.numpy as jnp
from jax.experimental import pallas as pl
from jax.experimental.pallas import tpu as pltpu

VOCAB_SIZE = 390
EMBED_DIM = 512


def embedding_lookup(indices, table, *, tn=256):
    """indices: int array (any shape), table: (V, D) f32 -> indices.shape + (D,)."""
    V, D = table.shape
    orig_shape = indices.shape
    N = math.prod(orig_shape)
    flat = indices.reshape(N).astype(jnp.int32)

    # Pad the token axis to a multiple of the tile size (pad ids = 0; the
    # padded rows are skipped in-kernel and sliced off below).
    n_pad = (-N) % tn
    if n_pad:
        flat = jnp.concatenate([flat, jnp.zeros((n_pad,), jnp.int32)])
    Np = N + n_pad

    def gather_kernel(ids_ref, table_ref, out_ref):
        # ids_ref  : (Np,) int32 in SMEM (scalar prefetch)
        # table_ref: (V, D) f32 VMEM-resident table (constant block index)
        # out_ref  : (tn, D) f32 VMEM output block for this grid step
        step = pl.program_id(0)
        base = step * tn

        @pl.loop(0, tn)
        def _(j):
            # Skip padded tail tokens of the last tile (N is a static int).
            @pl.when(base + j < N)
            def _():
                row = ids_ref[base + j]
                # Clamp instead of faulting on out-of-range ids (torch raises).
                row = jnp.minimum(jnp.maximum(row, 0), V - 1)
                out_ref[pl.ds(j, 1), :] = table_ref[pl.ds(row, 1), :]

    out = pl.pallas_call(
        gather_kernel,
        out_shape=jax.ShapeDtypeStruct((Np, D), table.dtype),
        grid_spec=pltpu.PrefetchScalarGridSpec(
            num_scalar_prefetch=1,                              # ids -> SMEM
            grid=(Np // tn,),
            in_specs=[
                # Full-block, constant index => table DMA'd once, VMEM-resident.
                pl.BlockSpec((V, D), lambda i, ids: (0, 0)),
            ],
            out_specs=pl.BlockSpec((tn, D), lambda i, ids: (i, 0)),
        ),
        compiler_params=pltpu.CompilerParams(
            dimension_semantics=("parallel",),                  # tiles shard across TCs (v7x)
        ),
    )(flat, table)

    return out[:N].reshape(*orig_shape, D)


if __name__ == "__main__":
    key = jax.random.PRNGKey(0)
    k_table, k_idx = jax.random.split(key)

    # Deterministic parameter init mimicking nn.Embedding default: N(0, 1).
    table = jax.random.normal(k_table, (VOCAB_SIZE, EMBED_DIM), jnp.float32)

    # Small input consistent with the module's forward: integer token ids.
    B, S = 8, 124                       # N = 992 -> padded to 1024 -> 4 tiles
    x = jax.random.randint(k_idx, (B, S), 0, VOCAB_SIZE, jnp.int32)

    out = embedding_lookup(x, table, tn=256)
    out = jax.block_until_ready(out)

    # Reference check (plain JAX gather) -- must match bit-for-bit.
    ref = jnp.take(table, x.reshape(-1), axis=0).reshape(B, S, EMBED_DIM)
    assert out.shape == (B, S, EMBED_DIM)
    assert out.dtype == jnp.float32
    assert jnp.array_equal(out, ref), "mismatch vs reference gather"

    print("KERNEL_OK")
</pallas_src>

<mosaic_0001>
module attributes {stable_mosaic.version = 11 : i64} {
  func.func @gather_kernel(%arg0: i32, %arg1: memref<1024xi32, #tpu.memory_space<smem>>, %arg2: memref<390x512xf32, #tpu.memory_space<vmem>>, %arg3: memref<256x512xf32, #tpu.memory_space<vmem>>) attributes {dimension_semantics = [#tpu.dimension_semantics<parallel>], iteration_bounds = array<i64: 4>, scalar_prefetch = 1 : i64, scratch_operands = 0 : i64, tpu.core_type = #tpu.core_type<tc>, window_params = [{pipeline_mode = #tpu.pipeline_mode<synchronous>, transform_indices = @transform_0, window_bounds = array<i64: 390, 512>}, {transform_indices = @transform_1, window_bounds = array<i64: 256, 512>}]} {
    %c256_i32 = arith.constant 256 : i32
    %0 = arith.muli %arg0, %c256_i32 : i32
    %c0_i32 = arith.constant 0 : i32
    %c256_i32_0 = arith.constant 256 : i32
    %1 = arith.addi %c0_i32, %c256_i32_0 : i32
    %c1_i32 = arith.constant 1 : i32
    scf.for %arg4 = %c0_i32 to %1 step %c1_i32  : i32 {
      %c1_i32_2 = arith.constant 1 : i32
      %2 = arith.muli %arg4, %c1_i32_2 : i32
      %c0_i32_3 = arith.constant 0 : i32
      %3 = arith.addi %c0_i32_3, %2 : i32
      %4 = arith.addi %0, %3 : i32
      %c992_i32 = arith.constant 992 : i32
      %5 = arith.cmpi slt, %4, %c992_i32 : i32
      %6 = arith.extui %5 : i1 to i32
      %c0_i32_4 = arith.constant 0 : i32
      %7 = arith.cmpi ne, %6, %c0_i32_4 : i32
      scf.if %7 {
        %8 = arith.addi %0, %3 : i32
        %9 = arith.index_cast %8 : i32 to index
        %10 = memref.load %arg1[%9] : memref<1024xi32, #tpu.memory_space<smem>>
        %c0_i32_5 = arith.constant 0 : i32
        %11 = arith.maxsi %10, %c0_i32_5 : i32
        %c389_i32 = arith.constant 389 : i32
        %12 = arith.minsi %11, %c389_i32 : i32
        %13 = arith.index_cast %12 : i32 to index
        %c0 = arith.constant 0 : index
        %14 = vector.load %arg2[%13, %c0] : memref<390x512xf32, #tpu.memory_space<vmem>>, vector<1x512xf32>
        %15 = arith.index_cast %3 : i32 to index
        %c0_6 = arith.constant 0 : index
        %16 = vector.load %arg3[%15, %c0_6] : memref<256x512xf32, #tpu.memory_space<vmem>>, vector<1x512xf32>
        tpu.vector_store %arg3[%15, %c0_6], %14 {strides = array<i32>} : memref<256x512xf32, #tpu.memory_space<vmem>>, vector<1x512xf32>,
      } else {
      }
    }
    %c256_i32_1 = arith.constant 256 : i32
    return
  }
  func.func @transform_0(%arg0: i32, %arg1: memref<1024xi32, #tpu.memory_space<smem>>) -> (i32, i32) {
    %c0_i32 = arith.constant 0 : i32
    %c0_i32_0 = arith.constant 0 : i32
    %c0_i32_1 = arith.constant 0 : i32
    return %c0_i32, %c0_i32_0 : i32, i32
  }
  func.func @transform_1(%arg0: i32, %arg1: memref<1024xi32, #tpu.memory_space<smem>>) -> (i32, i32) {
    %c0_i32 = arith.constant 0 : i32
    %c0_i32_0 = arith.constant 0 : i32
    return %arg0, %c0_i32 : i32, i32
  }
}

</mosaic_0001>

<bundles_post_ra>
// kernel: tpu_custom_call.1
= control target key start
LH: loop header
LB: loop body
LE: loop exit
PB: predicated region body
PF: predicated region fallthrough
CT: control target
= control target key end

     0   :  { %s446_s9 = smov [#allocation3]   ;;  %s605_s0 = inlined_call_operand.hbm [shape: s32[1024], index: 0, kind: input, shape index: {}]   ;;  %s606_s1 = inlined_call_operand.hbm [shape: f32[390,512], index: 1, kind: input, shape index: {}]   ;;  %s607_s2 = inlined_call_operand.hbm [shape: f32[1024,512], index: 2, kind: output, shape index: {}]  }
   0x1   :  { %8 = dma.hbm_to_smem %s605_s0, 128, %s446_s9, [#allocation2] }
   0x2   :  { %416 = dma.done.wait [#allocation2], 128 }
   0x3   :  { %417 = vsyncadd [#allocation2], 4294967168 }
   0x4   :  { %10 = sfence }
   0x5   :  { %11 = vsyncpa [#allocation5], 0 }
   0x6   :  { %12 = vsyncpa [#allocation6], 0 }
   0x7   :  { %14 = vsyncpa [#allocation6 + $0x1], 0  ;;  %s471_s12 = smov 0   ;;  %s473_s13 = smov 0  }
   0x8   :  { %s475_s14 = smov 0   ;;  %s477_s15 = smov 0  }
   0x9 LB: > { %s492_s0 = sadd.s32 4294967295, %s440_s15   ;;  %s244_s16 = sadd.s32 4294967294, %s440_s15   ;;  %s440_s15 = sphi %s477_s15, %s615_s15   ;;  %s436_s14 = sphi %s475_s14, %s614_s14   ;;  %s432_s13 = sphi %s473_s13, %s613_s13   ;;  %s428_s12 = sphi %s471_s12, %s612_s12  }
   0xa   : > { %s496_s17 = sadd.s32 1, %s440_s15   ;;  %s48_s18 = sadd.s32 1, %s436_s14 }
   0xb   : > { %s45_s19 = ssub.s32 %s440_s15, %s496_s17  ;;  %p58_p0 = scmp.ne.s32.totalorder %s436_s14, %s432_s13 }
   0xc   : > { %p46_p1 = scmp.eq.s32.totalorder %s45_s19, 0  ;;  %p59_p2 = scmp.eq.s32.totalorder %s492_s0, 3 }
   0xd   : > { %p64_p3 = scmp.ne.s32.totalorder %s432_s13, %s428_s12  ;;  %p65_p4 = scmp.eq.s32.totalorder %s244_s16, 3 }
   0xe   : > { %s507_s20 = scalar_select %p46_p1, %s436_s14, %s48_s18  }
   0xf   : > { %p509_p5 = por %p59_p2, %p58_p0  ;;  %p513_p6 = por %p65_p4, %p64_p3 }
  0x10   : > { %p245_p7 = scmp.ge.s32.totalorder %s440_s15, 1  ;;  %p72_p8 = scmp.lt.s32.totalorder %s440_s15, 5 }
  0x11   : > { %s609_s22 = scalar_select %p513_p6, 1, 0 }
  0x12   : > { %p287_p9 = scmp.eq.s32.totalorder %s492_s0, 0  ;;  %p520_p10 = pnand %p245_p7, %p72_p8 }
  0x13   : > { %s447_s24 = smov [#allocation4]  }
  0x14   : > { %s84_s25 = sshll.u32 %s447_s24, 4  ;;  %p279_p11 = pneg %p520_p10  ;;  %s85_s25 = int_to_ptr.vmem [resolvable:$true] %s84_s25 }
  0x15   : > { %s355_s26 = scalar_lea.vmem %s85_s25, 25088  ;;  %p363_p3 = scmp.lt.s32.totalorder %s85_s25, %s85_s25 }
  0x16   : > { %p280_p12 = pnand %p287_p9, %p279_p11  ;;  %p356_p0 = scmp.ne.s32.totalorder %s85_s25, %s355_s26 }
  0x17   : > { %p364_p4 = scmp.lt.s32.totalorder %s355_s26, %s355_s26 }
  0x18   : > { %p346_p13 = pneg %p280_p12 }
  0x19   : > { %p365_p6 = por %p364_p4, %p363_p3 }
  0x1a   : > { %p358_p1 = pnand %p356_p0, %p346_p13 }
  0x1c   : > { %p359_p2 = pneg %p358_p1 }
  0x1e   : > { %p366_p7 = pnand %p365_p6, %p359_p2 }
  0x20   : > { %369 = shalt.err (!%p366_p7)
}
  0x21   : > { %s448_s27 = smov 512   ;;  %s449_s28 = smov 32  }
  0x22   : > { %282 = dma.hbm_to_vmem [thread:$0]  (!%p280_p12), %s606_s1, 25088, %s85_s25, [#allocation5], %s448_s27, %s448_s27, %s449_s28  }
  0x23   : > { %100 = sbr.rel (%p520_p10) target bundleno = 89 (0x59), region = 24 }
  0x28   : > { %419 = dma.done.wait (%p287_p9), [#allocation5], 25088  }
  0x29   : > { %421 = vsyncadd (%p287_p9), [#allocation5], 4294942208  ;;  %s112_s3 = sand.u32 1, %s432_s13   ;;  %s250_s4 = sshll.u32 %s492_s0, 8 }
  0x2a   : > { %s541_s5 = sshll.u32 %s112_s3, 10  ;;  %s544_s7 = smov 0  }
  0x2b   : > { %s114_s6 = scalar_lea.vmem [#allocation7], %s541_s5 }
  0x2c LB: >> { %s123_s8 = sadd.s32 %s444_s7, %s250_s4  ;;  %s444_s7 = sphi %s544_s7, %s122_s7  }
  0x2d   : >> { %p251_p6 = scmp.ge.s32.totalorder %s123_s8, 992 }
  0x2e   : >> { %s128_s9 = sld [smem:[#allocation3 + %s123_s8]] (!%p251_p6)  ;;  %s146_s10 = sshra.s32 (!%p251_p6), %s444_s7, 3 }
  0x2f   : >> { %127 = sbr.rel (%p251_p6) target bundleno = 62 (0x3e), region = 39  ;;  %s149_s11 = sand.u32 (!%p251_p6), 7, %s444_s7 }
  0x30   : >> { %s270_s16 = sshll.u32 (!%p251_p6), %s146_s10, 5 }
  0x31   : >> { %s152_s18 = sadd.s32 (!%p251_p6), %s270_s16, %s149_s11 }
  0x32   : >> { %s153_s26 = scalar_lea.vmem (!%p251_p6), %s114_s6, %s152_s18 [#allocation7] }
  0x34   : >> { %p129_p8 = scmp.gt.s32.totalorder %s128_s9, 0  ;;  %p252_p9 = scmp.lt.s32.totalorder %s128_s9, 389  ;;  %v142_v0 = vlaneseq }
  0x36   : >> { %s617_s9 = smov (!%p129_p8, %s128_s9), 0  ;;  %vm144_vm0 = vcmp.lt.s32.totalorder %v142_v0, 512 }
  0x37   : >> { %s619_s9 = smov (!%p252_p9, %s617_s9), 389 }
  0x38   : >> { %s133_s19 = sshra.s32 %s619_s9, 3  ;;  %s136_s23 = sand.u32 7, %s619_s9 }
  0x39   : >> { %s269_s24 = sshll.u32 %s133_s19, 5 }
  0x3a   : >> { %s139_s25 = sadd.s32 %s269_s24, %s136_s23 }
  0x3b   : >> { %s140_s27 = scalar_lea.vmem [#allocation4], %s139_s25 }
  0x3c   : >> { %v141_v1 = vld [vmem:[%s140_s27] ss:$8 sm:$0xf] }
  0x3d   : >> { %154 = vst.msk [vmem:[%s153_s26] ss:$8 sm:$0xf] %vm144_vm0, %v141_v1 }
  0x3e PF: >> { %s122_s7 = sadd.s32 1, %s444_s7  }
  0x3f   : >> { %p119_p10 = scmp.ge.s32.totalorder %s122_s7, 256  }
  0x40   : > { %s272_s28 = sshll.u32 (%p119_p10), %s492_s0, 14  ;;  %s171_s9 = sshll.u32 (%p119_p10), %s114_s6, 4  ;;  %s561_s9 = int_to_ptr.vmem [resolvable:$true] %s171_s9 }
  0x41   : > { %121 = sbr.rel (!%p119_p10) target bundleno = 44 (0x2c), region = 74  ;;  %s557_s8 = scalar_lea.hbm (%p119_p10), %s607_s2, %s272_s28 }
  0x42   : > { %s565_s7 = scalar_lea.sflag (%p119_p10), [#allocation6], %s112_s3  ;;  %s370_s4 = scalar_lea.vmem (%p119_p10), %s561_s9, 16384 }
  0x43   : > { %p371_p11 = scmp.ne.s32.totalorder (%p119_p10), %s561_s9, %s370_s4  ;;  %s450_s0 = smov (%p119_p10), [#allocation7]  }
  0x44   : > { %s374_s10 = sshll.u32 (%p119_p10), %s450_s0, 4  ;;  %s375_s10 = int_to_ptr.vmem [resolvable:$false] %s374_s10 }
  0x45   : > { %p372_p12 = pnand (%p119_p10), %p371_p11, %p509_p5  ;;  %s376_s11 = scalar_lea.vmem (%p119_p10), %s375_s10, 32768 }
  0x46   : > { %p377_p0 = scmp.lt.s32.totalorder %s561_s9, %s375_s10  ;;  %p378_p1 = scmp.lt.s32.totalorder %s376_s11, %s370_s4 }
  0x47   : > { %p373_p13 = pneg %p372_p12 }
  0x48   : > { %p379_p2 = por %p378_p1, %p377_p0 }
  0x4a   : > { %p380_p3 = pnand %p379_p2, %p373_p13 }
  0x4c   : > { %383 = shalt.err (!%p380_p3)
}
  0x4d   : > { %s384_s3 = scalar_lea.hbm %s557_s8, 16384  ;;  %s388_s16 = scalar_lea.hbm %s607_s2, 65536 }
  0x4e   : > { %p385_p4 = scmp.ne.s32.totalorder %s557_s8, %s384_s3  ;;  %p389_p8 = scmp.lt.s32.totalorder %s557_s8, %s607_s2 }
  0x4f   : > { %p390_p9 = scmp.lt.s32.totalorder %s388_s16, %s384_s3 }
  0x50   : > { %p386_p7 = pnand %p385_p4, %p509_p5 }
  0x51   : > { %p391_p10 = por %p390_p9, %p389_p8 }
  0x52   : > { %p387_p6 = pneg %p386_p7 }
  0x54   : > { %p392_p11 = pnand %p391_p10, %p387_p6 }
  0x56   : > { %395 = shalt.err (!%p392_p11)
}
  0x57   : > { %s451_s23 = smov 512   ;;  %s452_s24 = smov 32  }
  0x58   : > { %277 = dma.vmem_to_hbm [thread:$0]  (%p509_p5), %s561_s9, 16384, %s557_s8, %s565_s7, %s451_s23, %s451_s23, %s452_s24  }
  0x59 PF: > { %p289_p12 = scmp.ge.s32.totalorder %s440_s15, 2  ;;  %s186_s25 = sand.u32 1, %s428_s12  }
  0x5a   : > { %p611_p13 = scmp.ne.s32.totalorder %s609_s22, 0  ;;  %s187_s26 = scalar_lea.sflag [#allocation6], %s186_s25 }
  0x5c   : > { %p284_p0 = pnand %p289_p12, %p611_p13 }
  0x5e   : > { %p285_p1 = pneg %p284_p0 }
  0x60   : > { %423 = dma.done.wait (%p285_p1), %s187_s26, 16384  }
  0x61   : > { %425 = vsyncadd (%p285_p1), %s187_s26, 4294950912  ;;  %p17_p2 = scmp.ge.s32.totalorder %s496_s17, 6   ;;  %s612_s12 = smov %s432_s13 }
  0x62   : > { %s613_s13 = smov %s436_s14  ;;  %s614_s14 = smov %s507_s20 }
  0x63   : > { %s615_s15 = smov %s496_s17  ;;  %19 = sbr.rel (!%p17_p2) target bundleno = 9 (0x9), region = 85 }
  0x68   :  { %192 = vsyncpa [#allocation5], 1 }
  0x69   :  { %194 = vsyncpa [#allocation5 + $0x1], 1 }
  0x6a   :  { %195 = vsyncpa [#allocation6], 1 }
  0x6b   :  { %197 = vsyncpa [#allocation6 + $0x1], 1 }

</bundles_post_ra>
